<compile_context>
chip_gen: v5e
topology: v5e:2x2
jax: 0.10.0
libtpu: 0.0.40
codegen_flags: <defaults>
</compile_context>

<pallas_src>
import functools

import jax
import jax.numpy as jnp
from jax.experimental import pallas as pl
from jax.experimental.pallas import tpu as pltpu


def _round_up(a, b):
    return ((a + b - 1) // b) * b


def _pad2(x, rows, cols):
    pr, pc = rows - x.shape[0], cols - x.shape[1]
    if pr == 0 and pc == 0:
        return x
    return jnp.pad(x, ((0, pr), (0, pc)))


# ----------------------------------------------------------------------------
# Kernel 1: encode pooling (L2-normalize tokens, mean of last `length` tokens)
# ----------------------------------------------------------------------------
def _pool_kernel(x_ref, lens_ref, out_ref, acc_ref, *, seq_len, tile_s):
    s_idx = pl.program_id(1)

    @pl.when(s_idx == 0)
    def _():
        acc_ref[...] = jnp.zeros_like(acc_ref)

    x = x_ref[...].astype(jnp.float32)                    # (bb, ts, H)
    lens = lens_ref[...]                                  # (bb, 1) int32

    # per-token L2 norm -> single coefficient (rsqrt on EUP, no (S,H) divide)
    ss = jnp.sum(x * x, axis=-1)                          # (bb, ts)
    inv_norm = jax.lax.rsqrt(jnp.maximum(ss, 1e-24))      # == 1/max(||x||,1e-12)

    # torch: mean over the last `length` tokens of the ORIGINAL sequence
    pos = jax.lax.broadcasted_iota(jnp.int32, ss.shape, 1) + s_idx * tile_s
    keep = jnp.logical_and(pos >= (seq_len - lens), pos < seq_len)  # (bb, ts)
    inv_len = 1.0 / jnp.maximum(lens.astype(jnp.float32), 1.0)      # (bb, 1)
    coeff = jnp.where(keep, inv_norm, 0.0) * inv_len                # (bb, ts)

    # single fused multiply + sublane reduction
    acc_ref[...] += jnp.sum(x * coeff[:, :, None], axis=1)          # (bb, H)

    @pl.when(s_idx == pl.num_programs(1) - 1)
    def _():
        out_ref[...] = acc_ref[...].astype(out_ref.dtype)


def encode_pool(seq_reps, attention_mask, *, block_b=8, tile_s=128,
                out_dtype=jnp.float32):
    """seq_reps: (B, S, H); attention_mask: (B, S) int (left-padded)."""
    B, S, H = seq_reps.shape
    lens = attention_mask.sum(axis=-1).astype(jnp.int32).reshape(B, 1)

    bb = min(block_b, _round_up(B, 8))
    ts = min(tile_s, _round_up(S, 8))
    # keep the (bb, ts, H) f32 input tile (double buffered) comfortably in VMEM
    max_ts = max(8, ((4 << 20) // (bb * H * 4)) // 8 * 8)
    ts = min(ts, max_ts)
    B_p = _round_up(B, bb)
    S_p = _round_up(S, ts)

    x = seq_reps
    if B_p != B or S_p != S:
        x = jnp.pad(x, ((0, B_p - B), (0, S_p - S), (0, 0)))
    lens_p = _pad2(lens, B_p, 1)

    grid = (B_p // bb, S_p // ts)
    out = pl.pallas_call(
        functools.partial(_pool_kernel, seq_len=S, tile_s=ts),
        out_shape=jax.ShapeDtypeStruct((B_p, H), out_dtype),
        grid=grid,
        in_specs=[
            pl.BlockSpec((bb, ts, H), lambda i, s: (i, s, 0)),
            pl.BlockSpec((bb, 1), lambda i, s: (i, 0)),
        ],
        out_specs=pl.BlockSpec((bb, H), lambda i, s: (i, 0)),
        scratch_shapes=[pltpu.VMEM((bb, H), jnp.float32)],
        compiler_params=pltpu.CompilerParams(
            dimension_semantics=("parallel", "arbitrary")),
    )(x, lens_p)
    return out[:B]


# ----------------------------------------------------------------------------
# Kernel 2: tiled logits + softmax cross-entropy (per-row loss, online LSE)
# ----------------------------------------------------------------------------
def _ce_kernel(q_ref, c_ref, lab_ref, out_ref,
               acc_ref, m_ref, l_ref, t_ref, *, inv_T, n_ctx, tile_c):
    j = pl.program_id(1)
    k = pl.program_id(2)
    nj = pl.num_programs(1)
    nk = pl.num_programs(2)

    @pl.when(jnp.logical_and(j == 0, k == 0))
    def _():
        m_ref[...] = jnp.full_like(m_ref, -1e30)
        l_ref[...] = jnp.zeros_like(l_ref)
        t_ref[...] = jnp.zeros_like(t_ref)

    @pl.when(k == 0)
    def _():
        acc_ref[...] = jnp.zeros_like(acc_ref)

    # contract H of both operands directly (no transpose / copy of C)
    acc_ref[...] += jax.lax.dot_general(
        q_ref[...], c_ref[...], (((1,), (1,)), ((), ())),
        preferred_element_type=jnp.float32)

    @pl.when(k == nk - 1)
    def _():
        logits = acc_ref[...] * inv_T                      # scaled once per tile
        col = (jax.lax.broadcasted_iota(jnp.int32, logits.shape, 1)
               + j * tile_c)
        logits = jnp.where(col < n_ctx, logits, -1e30)     # mask padded columns

        m_old = m_ref[...]
        m_new = jnp.maximum(m_old, jnp.max(logits, axis=-1, keepdims=True))
        alpha = jnp.exp(m_old - m_new)
        p = jnp.exp(logits - m_new)
        l_ref[...] = alpha * l_ref[...] + jnp.sum(p, axis=-1, keepdims=True)
        m_ref[...] = m_new

        onehot = col == lab_ref[...]                       # (tq, tc)
        t_ref[...] += jnp.sum(jnp.where(onehot, logits, 0.0), axis=-1,
                              keepdims=True)

    @pl.when(jnp.logical_and(j == nj - 1, k == nk - 1))
    def _():
        # per-row CE loss: logsumexp(logits) - logits[label]
        out_ref[...] = m_ref[...] + jnp.log(l_ref[...]) - t_ref[...]


def rank_loss(query_reps, context_reps, labels, T=0.01, *,
              tile_q=128, tile_c=256, tile_h=512):
    Nq, H = query_reps.shape
    Nc, Hc = context_reps.shape
    assert H == Hc

    tq = min(tile_q, _round_up(Nq, 8))
    tc = min(tile_c, _round_up(Nc, 8))
    th = min(tile_h, _round_up(H, 128))
    Nq_p, Nc_p, H_p = _round_up(Nq, tq), _round_up(Nc, tc), _round_up(H, th)

    q = _pad2(query_reps, Nq_p, H_p)
    c = _pad2(context_reps, Nc_p, H_p)
    lab = _pad2(labels.astype(jnp.int32).reshape(Nq, 1), Nq_p, 1)

    grid = (Nq_p // tq, Nc_p // tc, H_p // th)
    per_row = pl.pallas_call(
        functools.partial(_ce_kernel, inv_T=1.0 / T, n_ctx=Nc, tile_c=tc),
        out_shape=jax.ShapeDtypeStruct((Nq_p, 1), jnp.float32),
        grid=grid,
        in_specs=[
            pl.BlockSpec((tq, th), lambda i, j, k: (i, k)),
            pl.BlockSpec((tc, th), lambda i, j, k: (j, k)),
            pl.BlockSpec((tq, 1), lambda i, j, k: (i, 0)),
        ],
        out_specs=pl.BlockSpec((tq, 1), lambda i, j, k: (i, 0)),
        scratch_shapes=[
            pltpu.VMEM((tq, tc), jnp.float32),   # logits accumulator
            pltpu.VMEM((tq, 1), jnp.float32),    # running max
            pltpu.VMEM((tq, 1), jnp.float32),    # running sum
            pltpu.VMEM((tq, 1), jnp.float32),    # running target logit
        ],
        compiler_params=pltpu.CompilerParams(
            dimension_semantics=("parallel", "arbitrary", "arbitrary")),
    )(q, c, lab)
    # drop padded query rows before the mean (CrossEntropyLoss default = mean)
    return jnp.mean(per_row[:Nq, 0])


# ----------------------------------------------------------------------------
# Full forward (synthetic base_model = deterministic embedding lookup)
# ----------------------------------------------------------------------------
def decoder_only_bidense_forward(params, tokenized_queries, tokenized_contexts,
                                 target_labels, T=0.01):
    emb = params["embedding"]                              # (V, H)
    # TODO(synk): real base_model is a full transformer; embedding lookup stands in.
    q_hidden = emb[tokenized_queries["input_ids"]]         # (Nq, S, H)
    c_hidden = emb[tokenized_contexts["input_ids"]]        # (Nc, S, H)

    query_reps = encode_pool(q_hidden, tokenized_queries["attention_mask"])
    context_reps = encode_pool(c_hidden, tokenized_contexts["attention_mask"])

    n_query, n_context = query_reps.shape[0], context_reps.shape[0]
    assert n_context % n_query == 0, (n_context, n_query)
    return rank_loss(query_reps, context_reps, target_labels, T=T)


# ----------------------------------------------------------------------------
# Pure-JAX reference for verification
# ----------------------------------------------------------------------------
def _reference(params, tq, tc, labels, T):
    emb = params["embedding"]

    def enc(ids, mask):
        x = emb[ids]
        x = x / jnp.maximum(jnp.linalg.norm(x, axis=-1, keepdims=True), 1e-12)
        lens = mask.sum(-1)
        S = x.shape[1]
        reps = []
        for i in range(x.shape[0]):
            L = int(lens[i])
            reps.append(x[i, S - L:, :].mean(0))
        return jnp.stack(reps)

    q = enc(tq["input_ids"], tq["attention_mask"])
    c = enc(tc["input_ids"], tc["attention_mask"])
    logits = (q @ c.T) / T
    logp = jax.nn.log_softmax(logits, axis=-1)
    return -jnp.mean(logp[jnp.arange(q.shape[0]), labels])


if __name__ == "__main__":
    key = jax.random.PRNGKey(0)
    V, H, S = 64, 128, 8
    n_query, n_context = 2, 4
    T = 0.01

    k_emb, k_q, k_c = jax.random.split(key, 3)
    params = {"embedding": jax.random.normal(k_emb, (V, H), dtype=jnp.float32)}

    q_ids = jax.random.randint(k_q, (n_query, S), 0, V)
    c_ids = jax.random.randint(k_c, (n_context, S), 0, V)

    def left_pad_mask(lengths, S):
        pos = jnp.arange(S)[None, :]
        return (pos >= (S - jnp.asarray(lengths)[:, None])).astype(jnp.int32)

    q_mask = left_pad_mask([5, 8], S)
    c_mask = left_pad_mask([8, 6, 7, 8], S)

    tokenized_queries = {"input_ids": q_ids, "attention_mask": q_mask}
    tokenized_contexts = {"input_ids": c_ids, "attention_mask": c_mask}
    target_labels = jnp.array([0, 2], dtype=jnp.int32)

    loss = decoder_only_bidense_forward(
        params, tokenized_queries, tokenized_contexts, target_labels, T=T)
    loss = jax.block_until_ready(loss)

    ref = _reference(params, tokenized_queries, tokenized_contexts,
                     target_labels, T)
    assert jnp.allclose(loss, ref, rtol=2e-3, atol=2e-3), (loss, ref)

    print("KERNEL_OK")
</pallas_src>

<mosaic_0001>
module attributes {stable_mosaic.version = 11 : i64} {
  func.func @_pool_kernel(%arg0: i32, %arg1: i32, %arg2: memref<8x8x128xf32, #tpu.memory_space<vmem>>, %arg3: memref<8x1xi32, #tpu.memory_space<vmem>>, %arg4: memref<8x128xf32, #tpu.memory_space<vmem>>, %arg5: memref<8x128xf32, #tpu.memory_space<vmem>>) attributes {dimension_semantics = [#tpu.dimension_semantics<parallel>, #tpu.dimension_semantics<arbitrary>], iteration_bounds = array<i64: 1, 1>, scalar_prefetch = 0 : i64, scratch_operands = 1 : i64, tpu.core_type = #tpu.core_type<tc>, window_params = [{transform_indices = @transform_0, window_bounds = array<i64: 8, 8, 128>}, {transform_indices = @transform_1, window_bounds = array<i64: 8, 1>}, {transform_indices = @transform_2, window_bounds = array<i64: 8, 128>}]} {
    %c0_i32 = arith.constant 0 : i32
    %0 = arith.cmpi eq, %arg1, %c0_i32 : i32
    %1 = arith.extui %0 : i1 to i32
    %c0_i32_0 = arith.constant 0 : i32
    %2 = arith.cmpi ne, %1, %c0_i32_0 : i32
    scf.if %2 {
      %cst_18 = arith.constant 0.000000e+00 : f32
      %40 = vector.broadcast %cst_18 : f32 to vector<8x128xf32>
      %c0_19 = arith.constant 0 : index
      %c0_20 = arith.constant 0 : index
      %41 = vector.load %arg5[%c0_19, %c0_20] : memref<8x128xf32, #tpu.memory_space<vmem>>, vector<8x128xf32>
      tpu.vector_store %arg5[%c0_19, %c0_20], %40 {strides = array<i32>} : memref<8x128xf32, #tpu.memory_space<vmem>>, vector<8x128xf32>,
    } else {
    }
    %c0 = arith.constant 0 : index
    %c0_1 = arith.constant 0 : index
    %c0_2 = arith.constant 0 : index
    %3 = vector.load %arg2[%c0, %c0_1, %c0_2] : memref<8x8x128xf32, #tpu.memory_space<vmem>>, vector<8x8x128xf32>
    %c0_3 = arith.constant 0 : index
    %c0_4 = arith.constant 0 : index
    %4 = vector.load %arg3[%c0_3, %c0_4] : memref<8x1xi32, #tpu.memory_space<vmem>>, vector<8x1xi32>
    %5 = arith.mulf %3, %3 : vector<8x8x128xf32>
    %cst = arith.constant dense<0.000000e+00> : vector<8x8xf32>
    %6 = vector.multi_reduction <add>, %5, %cst [2] : vector<8x8x128xf32> to vector<8x8xf32>
    %cst_5 = arith.constant 1.000000e-24 : f32
    %7 = vector.broadcast %cst_5 : f32 to vector<8x8xf32>
    %8 = arith.maximumf %6, %7 : vector<8x8xf32>
    %9 = math.rsqrt %8 : vector<8x8xf32>
    %10 = tpu.iota {dimensions = array<i32: 1>} : vector<8x8xi32>
    %c8_i32 = arith.constant 8 : i32
    %11 = arith.muli %arg1, %c8_i32 : i32
    %12 = vector.broadcast %11 : i32 to vector<8x8xi32>
    %13 = arith.addi %10, %12 : vector<8x8xi32>
    %c8_i32_6 = arith.constant 8 : i32
    %14 = vector.broadcast %c8_i32_6 : i32 to vector<8x1xi32>
    %15 = arith.subi %14, %4 : vector<8x1xi32>
    %16 = vector.broadcast %15 : vector<8x1xi32> to vector<8x8xi32>
    %17 = arith.cmpi sge, %13, %16 : vector<8x8xi32>
    %c8_i32_7 = arith.constant 8 : i32
    %18 = vector.broadcast %c8_i32_7 : i32 to vector<8x8xi32>
    %19 = arith.cmpi slt, %13, %18 : vector<8x8xi32>
    %20 = arith.andi %17, %19 : vector<8x8xi1>
    %21 = arith.sitofp %4 : vector<8x1xi32> to vector<8x1xf32>
    %cst_8 = arith.constant 1.000000e+00 : f32
    %22 = vector.broadcast %cst_8 : f32 to vector<8x1xf32>
    %23 = arith.maximumf %21, %22 : vector<8x1xf32>
    %cst_9 = arith.constant 1.000000e+00 : f32
    %24 = vector.broadcast %cst_9 : f32 to vector<8x1xf32>
    %25 = arith.divf %24, %23 : vector<8x1xf32>
    %cst_10 = arith.constant 0.000000e+00 : f32
    %26 = vector.broadcast %cst_10 : f32 to vector<8x8xf32>
    %27 = arith.select %20, %9, %26 : vector<8x8xi1>, vector<8x8xf32>
    %28 = vector.broadcast %25 : vector<8x1xf32> to vector<8x8xf32>
    %29 = arith.mulf %27, %28 : vector<8x8xf32>
    %c0_11 = arith.constant 0 : index
    %c0_12 = arith.constant 0 : index
    %30 = vector.load %arg5[%c0_11, %c0_12] : memref<8x128xf32, #tpu.memory_space<vmem>>, vector<8x128xf32>
    %31 = vector.shape_cast %29 : vector<8x8xf32> to vector<8x8x1xf32>
    %32 = vector.broadcast %31 : vector<8x8x1xf32> to vector<8x8x128xf32>
    %33 = arith.mulf %3, %32 : vector<8x8x128xf32>
    %cst_13 = arith.constant dense<0.000000e+00> : vector<8x128xf32>
    %34 = vector.multi_reduction <add>, %33, %cst_13 [1] : vector<8x8x128xf32> to vector<8x128xf32>
    %35 = arith.addf %30, %34 : vector<8x128xf32>
    %c0_14 = arith.constant 0 : index
    %c0_15 = arith.constant 0 : index
    %36 = vector.load %arg5[%c0_14, %c0_15] : memref<8x128xf32, #tpu.memory_space<vmem>>, vector<8x128xf32>
    tpu.vector_store %arg5[%c0_14, %c0_15], %35 {strides = array<i32>} : memref<8x128xf32, #tpu.memory_space<vmem>>, vector<8x128xf32>,
    %c0_i32_16 = arith.constant 0 : i32
    %37 = arith.cmpi eq, %arg1, %c0_i32_16 : i32
    %38 = arith.extui %37 : i1 to i32
    %c0_i32_17 = arith.constant 0 : i32
    %39 = arith.cmpi ne, %38, %c0_i32_17 : i32
    scf.if %39 {
      %c0_18 = arith.constant 0 : index
      %c0_19 = arith.constant 0 : index
      %40 = vector.load %arg5[%c0_18, %c0_19] : memref<8x128xf32, #tpu.memory_space<vmem>>, vector<8x128xf32>
      %c0_20 = arith.constant 0 : index
      %c0_21 = arith.constant 0 : index
      %41 = vector.load %arg4[%c0_20, %c0_21] : memref<8x128xf32, #tpu.memory_space<vmem>>, vector<8x128xf32>
      tpu.vector_store %arg4[%c0_20, %c0_21], %40 {strides = array<i32>} : memref<8x128xf32, #tpu.memory_space<vmem>>, vector<8x128xf32>,
    } else {
    }
    return
  }
  func.func @transform_0(%arg0: i32, %arg1: i32) -> (i32, i32, i32) {
    %c0_i32 = arith.constant 0 : i32
    %c0_i32_0 = arith.constant 0 : i32
    return %arg0, %arg1, %c0_i32 : i32, i32, i32
  }
  func.func @transform_1(%arg0: i32, %arg1: i32) -> (i32, i32) {
    %c0_i32 = arith.constant 0 : i32
    %c0_i32_0 = arith.constant 0 : i32
    return %arg0, %c0_i32 : i32, i32
  }
  func.func @transform_2(%arg0: i32, %arg1: i32) -> (i32, i32) {
    %c0_i32 = arith.constant 0 : i32
    %c0_i32_0 = arith.constant 0 : i32
    return %arg0, %c0_i32 : i32, i32
  }
}

</mosaic_0001>

<bundles_post_ra>
// kernel: tpu_custom_call.1
= control target key start
LH: loop header
LB: loop body
LE: loop exit
PB: predicated region body
PF: predicated region fallthrough
CT: control target
= control target key end

     0   :  { %7 = vsyncpa [#allocation4], 0  ;;  %s673_s0 = inlined_call_operand.hbm [shape: f32[8,8,128], index: 0, kind: input, shape index: {}]   ;;  %s674_s1 = inlined_call_operand.vmem [shape: s32[8,1], index: 1, kind: input, shape index: {}]   ;;  %s675_s2 = inlined_call_operand.hbm [shape: f32[8,128], index: 2, kind: output, shape index: {}]  }
   0x1   :  { %8 = vsyncpa [#allocation5], 0  ;;  %s13_s11 = sshll.u32 %s673_s0, 4  ;;  %s454_s12 = smov [#allocation3]   ;;  %s14_s11 = int_to_ptr.hbm [resolvable:$true] %s13_s11 }
   0x2   :  { %s15_s13 = sshll.u32 %s454_s12, 4  ;;  %s455_s14 = smov 128   ;;  %s16_s13 = int_to_ptr.vmem [resolvable:$true] %s15_s13 }
   0x3   :  { %s456_s15 = smov 8  }
   0x4   :  { %21 = dma.hbm_to_vmem [thread:$0]  %s14_s11, 1024, %s16_s13, [#allocation4], %s455_s14, %s455_s14, %s456_s15  }
   0x5   :  { %450 = dma.done.wait [#allocation4], 1024  }
   0x6   :  { %451 = vsyncadd [#allocation4], 4294966272  ;;  %v457_v0 = vmov 0   ;;  %v477_v1 = vld [vmem:[#allocation3 + $0x20] sm:$0xff]  ;;  %v479_v2 = vld [vmem:[#allocation3 + $0x10] sm:$0xff]  ;;  %v154_v37 = vlaneseq  ;;  %s364_s20 = sshll.u32 %s675_s2, 4  ;;  %s365_s20 = int_to_ptr.hbm [resolvable:$true] %s364_s20 }
   0x7   :  { %380 = vset.pattern.permute.xlu0 %v457_v0  ;;  %379 = vset.pattern.permute.xlu2 %v457_v0  ;;  %v481_v3 = vld [vmem:[#allocation3] sm:$0xff]  ;;  %v46_v4 = vmul.f32 %v477_v1, %v477_v1  ;;  %v44_v5 = vmul.f32 %v479_v2, %v479_v2  ;;  %v492_v9 = vld [vmem:[#allocation3 + $0x28] sm:$0xff]  ;;  %v494_v10 = vld [vmem:[#allocation3 + $0x18] sm:$0xff] }
   0x8   :  { %v42_v6 = vmul.f32 %v481_v3, %v481_v3  ;;  %v41_v7 = vld [vmem:[%s674_s1] sm:$0xff]  ;;  %v496_v11 = vld [vmem:[#allocation3 + $0x8] sm:$0xff]  ;;  %v47_v13 = vmul.f32 %v492_v9, %v492_v9  ;;  %v45_v14 = vmul.f32 %v494_v10, %v494_v10  ;;  %v504_v16 = vld [vmem:[#allocation3 + $0x38] sm:$0xff]  ;;  %v224_v43 = vshrl.u32 %v154_v37, 7  ;;  %s458_s1 = smov [#allocation6]  }
   0x9   :  { %58 = vadd.xlane.f32.xlu2 %v46_v4  ;;  %54 = vadd.xlane.f32.xlu1 %v44_v5  ;;  %v166_v8 = vcvt.s32.f32 %v41_v7  ;;  %v43_v15 = vmul.f32 %v496_v11, %v496_v11  ;;  %v506_v17 = vld [vmem:[#allocation3 + $0x30] sm:$0xff]  ;;  %v49_v19 = vmul.f32 %v504_v16, %v504_v16  ;;  %v159_v27 = vsub.s32 8, %v41_v7  ;;  %s362_s17 = sshll.u32 %s458_s1, 4  ;;  %s363_s17 = int_to_ptr.vmem [resolvable:$true] %s362_s17 }
   0xa   :  { %50 = vadd.xlane.f32.xlu0 %v42_v6  ;;  %v48_v20 = vmul.f32 %v506_v17, %v506_v17  ;;  %381 = vset.pattern.permute.xlu1 %v224_v43 }
   0xb   :  { %v167_v12 = vmax.f32 %v166_v8, 1.0 }
   0xd   :  { %384 = vrcp.f32 %v167_v12  ;;  %vm173_vm0 = vweird.f32 %v167_v12  ;;  %v179_v24 = vand.u32 2147483648, %v167_v12  ;;  %v177_v26 = vand.u32 2147483647, %v167_v12 }
   0xf   :  { %v180_v28 = vor.u32 1.1754944e-38, %v179_v24  ;;  %vm178_vm3 = vcmp.eq.f32.partialorder %v177_v26, 8.507059e+37 }
  0x11   :  { %60 = vadd.xlane.f32.xlu2 %v47_v13  ;;  %56 = vadd.xlane.f32.xlu1 %v45_v14 }
  0x12   :  { %52 = vadd.xlane.f32.xlu0 %v43_v15  ;;  %v562_v15 = vand.u32 127, %v154_v37 }
  0x13   :  { %v385_v18 = vpop.eup %384 }
  0x14   :  { %v169_v21 = vmul.f32 %v385_v18, %v167_v12  ;;  %vm174_vm1 = vweird.f32 %v385_v18 }
  0x15   :  { %vm175_vm2 = vmor %vm173_vm0, %vm174_vm1  ;;  %vm199_vm0 = vcmask 1041409   ;;  %vm201_vm1 = vcmask 1042434  }
  0x16   :  { %v170_v22 = vsub.f32 1.0, %v169_v21 }
  0x18   :  { %v171_v23 = vmul.f32 %v385_v18, %v170_v22 }
  0x19   :  { %64 = vadd.xlane.f32.xlu1 %v49_v19 }
  0x1a   :  { %62 = vadd.xlane.f32.xlu0 %v48_v20  ;;  %v172_v25 = vadd.f32 %v385_v18, %v171_v23 }
  0x1c   :  { %v176_v29 = vsel %vm175_vm2, %v385_v18, %v172_v25 }
  0x1d   :  { %v181_v30 = vsel %vm178_vm3, %v180_v28, %v176_v29 }
  0x29   :  { %161 = vperm.xlu2 %379, %v159_v27  }
  0x2e   :  { %217 = vperm.xlu0 %380, %v181_v30  }
  0x31   :  { %382 = vset.pattern.permute.xlu2 %v224_v43 }
  0x36   :  { %383 = vset.pattern.permute.xlu0 %v224_v43 }
  0x7c   :  { %v59_v31 = vpop.xlane.xlu2 %58  ;;  %v55_v32 = vpop.xlane.xlu1 %54 }
  0x7d   :  { %v512_v33 = vmax.f32 %v55_v32, 1e-24  ;;  %v51_v34 = vpop.xlane.xlu0 %50  ;;  %v514_v35 = vmax.f32 %v59_v31, 1e-24 }
  0x7e   :  { %v516_v36 = vmax.f32 %v51_v34, 1e-24 }
  0x7f   :  { %386 = vrsqrt.f32 %v512_v33  ;;  %vm120_vm4 = vweird.f32 %v514_v35  ;;  %vm100_vm9 = vweird.f32 %v512_v33 }
  0x80   :  { %388 = vrsqrt.f32 %v516_v36  ;;  %vm80_vm7 = vweird.f32 %v516_v36 }
  0x81   :  { %390 = vrsqrt.f32 %v514_v35 }
  0x84   :  { %v61_v38 = vpop.xlane.xlu2 %60  ;;  %v57_v39 = vpop.xlane.xlu1 %56 }
  0x85   :  { %v521_v40 = vmax.f32 %v61_v38, 1e-24  ;;  %v523_v41 = vmax.f32 %v57_v39, 1e-24  ;;  %v53_v42 = vpop.xlane.xlu0 %52  ;;  %v525_v44 = vpop.eup %386 }
  0x86   :  { %v527_v45 = vmax.f32 %v53_v42, 1e-24  ;;  %v529_v46 = vpop.eup %388  ;;  %v95_v47 = vmul.f32 %v525_v44, %v512_v33  ;;  %vm101_vm6 = vweird.f32 %v525_v44 }
  0x87   :  { %392 = vrsqrt.f32 %v521_v40  ;;  %v534_v48 = vpop.eup %390  ;;  %v75_v49 = vmul.f32 %v529_v46, %v516_v36  ;;  %vm81_vm5 = vweird.f32 %v529_v46  ;;  %vm581_vm13 = vmor %vm100_vm9, %vm101_vm6  ;;  %vm110_vm2 = vweird.f32 %v523_v41 }
  0x88   :  { %394 = vrsqrt.f32 %v523_v41  ;;  %v96_v50 = vmul.f32 %v525_v44, %v95_v47  ;;  %v115_v52 = vmul.f32 %v534_v48, %v514_v35  ;;  %vm575_vm10 = vmor %vm80_vm7, %vm81_vm5  ;;  %vm90_vm12 = vweird.f32 %v527_v45 }
  0x89   :  { %396 = vrsqrt.f32 %v527_v45  ;;  %v76_v51 = vmul.f32 %v529_v46, %v75_v49  ;;  %vm121_vm14 = vweird.f32 %v534_v48  ;;  %vm203_vm5 = vcmask 1043459  }
  0x8a   :  { %v97_v56 = vmul.f32 0.5, %v96_v50  ;;  %v116_v61 = vmul.f32 %v534_v48, %v115_v52  ;;  %vm130_vm6 = vweird.f32 %v521_v40 }
  0x8b   :  { %v77_v53 = vmul.f32 0.5, %v76_v51 }
  0x8c   :  { %v65_v54 = vpop.xlane.xlu1 %64  ;;  %v98_v5 = vsub.f32 1.5, %v97_v56  ;;  %v117_v13 = vmul.f32 0.5, %v116_v61  ;;  %v162_v61 = vpop.permute.xlu2 %161 }
  0x8d   :  { %v544_v55 = vpop.eup %392  ;;  %v546_v57 = vmax.f32 %v65_v54, 1e-24  ;;  %v63_v63 = vpop.xlane.xlu0 %62  ;;  %v78_v0 = vsub.f32 1.5, %v77_v53 }
  0x8e   :  { %v548_v58 = vpop.eup %394  ;;  %v125_v59 = vmul.f32 %v544_v55, %v521_v40  ;;  %v559_v12 = vmax.f32 %v63_v63, 1e-24  ;;  %v99_v21 = vmul.f32 %v525_v44, %v98_v5  ;;  %v118_v26 = vsub.f32 1.5, %v117_v13 }
  0x8f   :  { %v397_v60 = vpop.eup %396  ;;  %v105_v62 = vmul.f32 %v548_v58, %v523_v41  ;;  %398 = vrsqrt.f32 %v546_v57  ;;  %v79_v18 = vmul.f32 %v529_v46, %v78_v0  ;;  %vm111_vm11 = vweird.f32 %v548_v58 }
  0x90   :  { %v85_v4 = vmul.f32 %v397_v60, %v527_v45  ;;  %v126_v7 = vmul.f32 %v544_v55, %v125_v59  ;;  %400 = vrsqrt.f32 %v559_v12  ;;  %vm91_vm8 = vweird.f32 %v397_v60  ;;  %vm598_vm3 = vmor %vm110_vm2, %vm111_vm11 }
  0x91   :  { %v106_v6 = vmul.f32 %v548_v58, %v105_v62  ;;  %v83_v29 = vsel %vm575_vm10, %v529_v46, %v79_v18  ;;  %v103_v33 = vsel %vm581_vm13, %v525_v44, %v99_v21  ;;  %vm92_vm15 = vmor %vm90_vm12, %vm91_vm8  ;;  %v119_v39 = vmul.f32 %v534_v48, %v118_v26 }
  0x92   :  { %v86_v8 = vmul.f32 %v397_v60, %v85_v4  ;;  %v127_v23 = vmul.f32 0.5, %v126_v7  ;;  %v191_v44 = vperm.slane %v83_v29, %v562_v15  ;;  %v193_v47 = vperm.slane %v103_v33, %v562_v15  ;;  %vm616_vm8 = vmor %vm120_vm4, %vm121_vm14 }
  0x93   :  { %v107_v14 = vmul.f32 0.5, %v106_v6  ;;  %vm131_vm7 = vweird.f32 %v544_v55  ;;  %v123_v54 = vsel %vm616_vm8, %v534_v48, %v119_v39  ;;  %vm150_vm4 = vweird.f32 %v546_v57 }
  0x94   :  { %v87_v19 = vmul.f32 0.5, %v86_v8  ;;  %v128_v36 = vsub.f32 1.5, %v127_v23  ;;  %vm628_vm10 = vmor %vm130_vm6, %vm131_vm7  ;;  %vm205_vm13 = vcmask 1044484   ;;  %vm140_vm14 = vweird.f32 %v559_v12 }
  0x95   :  { %v567_v20 = vpop.eup %398  ;;  %v108_v22 = vsub.f32 1.5, %v107_v14  ;;  %vm164_vm2 = vcmp.lt.s32.totalorder %v562_v15, 8  ;;  %vm207_vm6 = vcmask 1045509   ;;  %vm209_vm7 = vcmask 1046534  }
  0x96   :  { %v88_v24 = vsub.f32 1.5, %v87_v19  ;;  %v145_v25 = vmul.f32 %v567_v20, %v546_v57  ;;  %v401_v34 = vpop.eup %400  ;;  %v129_v52 = vmul.f32 %v544_v55, %v128_v36  ;;  %vm151_vm9 = vweird.f32 %v567_v20 }
  0x97   :  { %v109_v30 = vmul.f32 %v548_v58, %v108_v22  ;;  %v135_v43 = vmul.f32 %v401_v34, %v559_v12  ;;  %vm633_vm11 = vmor %vm150_vm4, %vm151_vm9  ;;  %vm141_vm12 = vweird.f32 %v401_v34  ;;  %v195_v57 = vperm.slane %v123_v54, %v562_v15 }
  0x98   :  { %v89_v31 = vmul.f32 %v397_v60, %v88_v24  ;;  %v146_v32 = vmul.f32 %v567_v20, %v145_v25  ;;  %v133_v48 = vsel %vm628_vm10, %v544_v55, %v129_v52  ;;  %vm211_vm8 = vcmask 1047559  }
  0x99   :  { %v113_v41 = vsel %vm598_vm3, %v548_v58, %v109_v30  ;;  %v136_v49 = vmul.f32 %v401_v34, %v135_v43  ;;  %vm163_vm3 = vcmp.ge.s32.totalorder %v562_v15, %v162_v61  ;;  %v196_v55 = vperm.slane %v133_v48, %v562_v15 }
  0x9a   :  { %v93_v37 = vsel %vm92_vm15, %v397_v60, %v89_v31  ;;  %v147_v38 = vmul.f32 0.5, %v146_v32  ;;  %v194_v58 = vperm.slane %v113_v41, %v562_v15  ;;  %vm142_vm15 = vmor %vm140_vm14, %vm141_vm12 }
  0x9b   :  { %v192_v45 = vperm.slane %v93_v37, %v562_v15  ;;  %v137_v56 = vmul.f32 0.5, %v136_v49  ;;  %vm165_vm9 = vmand %vm163_vm3, %vm164_vm2 }
  0x9c   :  { %v148_v46 = vsub.f32 1.5, %v147_v38 }
  0x9d   :  { %v200_v50 = vsel %vm199_vm0, %v192_v45, %v191_v44  ;;  %v138_v60 = vsub.f32 1.5, %v137_v56 }
  0x9e   :  { %v149_v53 = vmul.f32 %v567_v20, %v148_v46  ;;  %v202_v40 = vsel %vm201_vm1, %v193_v47, %v200_v50 }
  0x9f   :  { %v204_v62 = vsel %vm203_vm5, %v194_v58, %v202_v40  ;;  %v139_v0 = vmul.f32 %v401_v34, %v138_v60 }
  0xa0   :  { %v153_v63 = vsel %vm633_vm11, %v567_v20, %v149_v53  ;;  %v206_v4 = vsel %vm205_vm13, %v195_v57, %v204_v62  ;;  %v218_v13 = vpop.permute.xlu0 %217 }
  0xa1   :  { %v143_v5 = vsel %vm142_vm15, %v401_v34, %v139_v0  ;;  %v198_v6 = vperm.slane %v153_v63, %v562_v15  ;;  %v208_v8 = vsel %vm207_vm6, %v196_v55, %v206_v4 }
  0xa2   :  { %v197_v7 = vperm.slane %v143_v5, %v562_v15 }
  0xa4   :  { %v210_v12 = vsel %vm209_vm7, %v197_v7, %v208_v8 }
  0xa5   :  { %v212_v14 = vsel %vm211_vm8, %v198_v6, %v210_v12 }
  0xa6   :  { %v214_v18 = vsel %vm165_vm9, %v212_v14, 0.0 }
  0xa7   :  { %v220_v19 = vmul.f32 %v218_v13, %v214_v18 }
  0xa9   :  { %v264_v20 = vperm.slane %v220_v19, 6  ;;  %v229_v21 = vperm.slane %v220_v19, 1  ;;  %v222_v22 = vperm.slane %v220_v19, 0  ;;  %v236_v23 = vperm.slane %v220_v19, 2 }
  0xaa   :  { %v243_v24 = vperm.slane %v220_v19, 3  ;;  %v250_v15 = vperm.slane %v220_v19, 4  ;;  %v257_v25 = vperm.slane %v220_v19, 5  ;;  %v271_v26 = vperm.slane %v220_v19, 7 }
  0xab   :  { %269 = vperm.xlu0 %383, %v264_v20   ;;  %234 = vperm.xlu2 %382, %v229_v21  }
  0xac   :  { %227 = vperm.xlu1 %381, %v222_v22  }
  0xb3   :  { %241 = vperm.xlu2 %382, %v236_v23  }
  0xb4   :  { %248 = vperm.xlu1 %381, %v243_v24  }
  0xbb   :  { %255 = vperm.xlu2 %382, %v250_v15  }
  0xbc   :  { %262 = vperm.xlu1 %381, %v257_v25  }
  0xc3   :  { %276 = vperm.xlu2 %382, %v271_v26  }
 0x105   :  { %v235_v27 = vpop.permute.xlu2 %234 }
 0x106   :  { %v279_v30 = vmul.f32 %v235_v27, %v496_v11 }
 0x108   :  { %v292_v33 = vrot.slane %v279_v30, 4 }
 0x10a   :  { %v293_v43 = vadd.f32 %v292_v33, %v279_v30 }
 0x10c   :  { %v294_v49 = vrot.slane %v293_v43, 2 }
 0x10d   :  { %v242_v28 = vpop.permute.xlu2 %241 }
 0x10e   :  { %v280_v31 = vmul.f32 %v242_v28, %v479_v2  ;;  %v295_v54 = vadd.f32 %v294_v49, %v293_v43 }
 0x110   :  { %v298_v38 = vrot.slane %v280_v31, 4  ;;  %v296_v62 = vrot.slane %v295_v54, 1 }
 0x112   :  { %v299_v11 = vadd.f32 %v298_v38, %v280_v31  ;;  %v297_v7 = vadd.f32 %v296_v62, %v295_v54 }
 0x114   :  { %v300_v40 = vrot.slane %v299_v11, 2 }
 0x115   :  { %v256_v29 = vpop.permute.xlu2 %255 }
 0x116   :  { %v282_v39 = vmul.f32 %v256_v29, %v477_v1 }
 0x118   :  { %v310_v47 = vrot.slane %v282_v39, 4 }
 0x11a   :  { %v311_v1 = vadd.f32 %v310_v47, %v282_v39 }
 0x11c   :  { %v312_v60 = vrot.slane %v311_v1, 2 }
 0x11d   :  { %v270_v36 = vpop.permute.xlu0 %269  ;;  %v277_v42 = vpop.permute.xlu2 %276 }
 0x11e   :  { %v228_v32 = vpop.permute.xlu1 %227  ;;  %v284_v45 = vmul.f32 %v270_v36, %v506_v17  ;;  %v285_v41 = vmul.f32 %v277_v42, %v504_v16  ;;  %v301_v16 = vadd.f32 %v300_v40, %v299_v11  ;;  %v313_v6 = vadd.f32 %v312_v60, %v311_v1 }
 0x11f   :  { %v278_v34 = vmul.f32 %v228_v32, %v481_v3 }
 0x120   :  { %v322_v3 = vrot.slane %v284_v45, 4  ;;  %v328_v51 = vrot.slane %v285_v41, 4  ;;  %v302_v55 = vrot.slane %v301_v16, 1  ;;  %v314_v21 = vrot.slane %v313_v6, 1 }
 0x121   :  { %v286_v37 = vrot.slane %v278_v34, 4 }
 0x122   :  { %v323_v58 = vadd.f32 %v322_v3, %v284_v45  ;;  %v329_v35 = vadd.f32 %v328_v51, %v285_v41  ;;  %v303_v20 = vadd.f32 %v302_v55, %v301_v16  ;;  %v315_v26 = vadd.f32 %v314_v21, %v313_v6 }
 0x123   :  { %v287_v44 = vadd.f32 %v286_v37, %v278_v34 }
 0x124   :  { %v330_v57 = vrot.slane %v329_v35, 2 }
 0x125   :  { %v288_v46 = vrot.slane %v287_v44, 2 }
 0x126   :  { %v249_v2 = vpop.permute.xlu1 %248  ;;  %v331_v13 = vadd.f32 %v330_v57, %v329_v35 }
 0x127   :  { %v281_v50 = vmul.f32 %v249_v2, %v494_v10  ;;  %v289_v52 = vadd.f32 %v288_v46, %v287_v44  ;;  %v324_v10 = vrot.slane %v323_v58, 2 }
 0x128   :  { %v332_v24 = vrot.slane %v331_v13, 1 }
 0x129   :  { %v304_v53 = vrot.slane %v281_v50, 4  ;;  %v290_v17 = vrot.slane %v289_v52, 1  ;;  %v325_v12 = vadd.f32 %v324_v10, %v323_v58 }
 0x12a   :  { %v333_v30 = vadd.f32 %v332_v24, %v331_v13 }
 0x12b   :  { %v305_v56 = vadd.f32 %v304_v53, %v281_v50  ;;  %v291_v0 = vadd.f32 %v290_v17, %v289_v52  ;;  %v326_v23 = vrot.slane %v325_v12, 1 }
 0x12d   :  { %v306_v59 = vrot.slane %v305_v56, 2  ;;  %v342_v14 = vsel %vm199_vm0, %v297_v7, %v291_v0  ;;  %v327_v28 = vadd.f32 %v326_v23, %v325_v12 }
 0x12e   :  { %v263_v61 = vpop.permute.xlu1 %262 }
 0x12f   :  { %v307_v48 = vadd.f32 %v306_v59, %v305_v56  ;;  %v283_v63 = vmul.f32 %v263_v61, %v492_v9  ;;  %v343_v9 = vsel %vm201_vm1, %v303_v20, %v342_v14 }
 0x131   :  { %v308_v4 = vrot.slane %v307_v48, 1  ;;  %v316_v5 = vrot.slane %v283_v63, 4 }
 0x133   :  { %v317_v8 = vadd.f32 %v316_v5, %v283_v63  ;;  %v309_v18 = vadd.f32 %v308_v4, %v307_v48 }
 0x135   :  { %v318_v19 = vrot.slane %v317_v8, 2  ;;  %v344_v15 = vsel %vm203_vm5, %v309_v18, %v343_v9 }
 0x136   :  { %v345_v29 = vsel %vm205_vm13, %v315_v26, %v344_v15 }
 0x137   :  { %v319_v22 = vadd.f32 %v318_v19, %v317_v8 }
 0x139   :  { %v320_v25 = vrot.slane %v319_v22, 1 }
 0x13b   :  { %v321_v27 = vadd.f32 %v320_v25, %v319_v22 }
 0x13d   :  { %v346_v31 = vsel %vm207_vm6, %v321_v27, %v345_v29 }
 0x13e   :  { %v347_v32 = vsel %vm209_vm7, %v327_v28, %v346_v31 }
 0x13f   :  { %v348_v33 = vsel %vm211_vm8, %v333_v30, %v347_v32 }
 0x140   :  { %356 = vst [vmem:[#allocation6] sm:$0xff] %v348_v33 }
 0x141   :  { %367 = dma.vmem_to_hbm [thread:$0]  %s363_s17, 128, %s365_s20, [#allocation5]  }
 0x142   :  { %452 = dma.done.wait [#allocation5], 128  }
 0x143   :  { %453 = vsyncadd [#allocation5], 4294967168 }
 0x144   :  { %372 = vsyncpa [#allocation4], 1 }
 0x145   :  { %373 = vsyncpa [#allocation5], 1 }

</bundles_post_ra>
